<compile_context>
chip_gen: v6e
topology: v6e:2x2x1
jax: 0.10.0
libtpu: 0.0.40
codegen_flags: <defaults>
</compile_context>

<pallas_src>
import functools

import jax
import jax.numpy as jnp
from jax.experimental import pallas as pl
from jax.experimental.pallas import tpu as pltpu


def _outconv_kernel(x_ref, w_ref, b_ref, o_ref):
    # x_ref: (1, C_in, t)   w_ref: (C_out, C_in)   b_ref: (C_out, 1)
    # o_ref: (1, C_out, t)  -- t is lane-aligned (multiple of 128, or full HW),
    # so both the load and the store are lane-dense.
    acc = jnp.dot(w_ref[...], x_ref[0], preferred_element_type=jnp.float32)
    o_ref[0] = (acc + b_ref[...]).astype(o_ref.dtype)


def _vmem_budget_bytes():
    # Per-chip scoped-VMEM budget: half of physical capacity, capped at 48 MiB.
    #   v5e/v6e (128 MiB physical) -> 48 MiB,  v7x (64 MiB per TC) -> 32 MiB.
    cap = None
    try:
        info = pltpu.get_tpu_info()
        cap = getattr(info, "vmem_capacity_bytes", None)
    except Exception:
        cap = None
    if not cap:
        cap = 64 * 1024 * 1024  # conservative fallback: assume v7x
    return int(min(cap // 2, 48 * 1024 * 1024))


@functools.partial(jax.jit, static_argnames=("tile_pixels",))
def out_conv(x_nchw, weight, bias, *, tile_pixels=8192):
    """1x1 Conv2d forward (matches nn.Conv2d(in, out, kernel_size=1)).

    x_nchw: (N, C_in, H, W)
    weight: (C_out, C_in, 1, 1)   (PyTorch conv weight layout)
    bias:   (C_out,)
    returns (N, C_out, H, W)
    """
    N, C_in, H, W = x_nchw.shape
    C_out = weight.shape[0]
    HW = H * W

    # TODO(synk): the (N,C,H,W)->(N,C,H*W) reshape (and its inverse) may insert
    # an XLA relayout copy around the custom call on TPU tiled layouts; when
    # embedding this kernel in a model, keep activations in (N, C, H*W) layout
    # so these become true no-ops.
    x3d = x_nchw.reshape(N, C_in, HW)           # (N, C_in, H*W), no transpose
    w2d = weight.reshape(C_out, C_in)           # (C_out, C_in)
    b2d = bias.reshape(C_out, 1)                # broadcast along lanes in-kernel

    # --- pixel-tile selection ------------------------------------------------
    itemsize = jnp.dtype(x_nchw.dtype).itemsize
    budget = _vmem_budget_bytes()
    param_bytes = 2 * (C_out * C_in + C_out) * itemsize      # W + b (buffered)
    per_pixel_bytes = 2 * (C_in + C_out) * itemsize          # 2 bufs x (x + y)
    max_t_vmem = max(128, ((budget - param_bytes) // per_pixel_bytes) // 128 * 128)

    hw_up128 = ((HW + 127) // 128) * 128
    t = min(tile_pixels, max_t_vmem, hw_up128)
    # v7x megacore: with batch 1 make sure the pixel axis gets >= 2 blocks so
    # both TensorCores are busy (harmless on single-TC v5e/v6e).
    if N == 1 and HW > 128 and t >= HW:
        t = hw_up128 // 2
    t = max(128, (t // 128) * 128)
    if t >= HW:
        t = HW    # single full block; "full dim" satisfies the lane/layout rule
    n_tiles = pl.cdiv(HW, t)                     # ragged last block is masked

    y3d = pl.pallas_call(
        _outconv_kernel,
        out_shape=jax.ShapeDtypeStruct((N, C_out, HW), x_nchw.dtype),
        grid_spec=pltpu.PrefetchScalarGridSpec(
            num_scalar_prefetch=0,
            grid=(N, n_tiles),
            in_specs=[
                pl.BlockSpec((1, C_in, t), lambda n, p: (n, 0, p)),
                pl.BlockSpec((C_out, C_in), lambda n, p: (0, 0)),
                pl.BlockSpec((C_out, 1), lambda n, p: (0, 0)),
            ],
            out_specs=pl.BlockSpec((1, C_out, t), lambda n, p: (n, 0, p)),
        ),
        compiler_params=pltpu.CompilerParams(
            dimension_semantics=("parallel", "parallel"),
            vmem_limit_bytes=budget,
        ),
    )(x3d, w2d, b2d)

    return y3d.reshape(N, C_out, H, W)


def _ref_conv1x1(x, weight, bias):
    C_out, C_in = weight.shape[0], weight.shape[1]
    return (
        jnp.einsum("nchw,oc->nohw", x, weight.reshape(C_out, C_in))
        + bias[None, :, None, None]
    )


if __name__ == "__main__":
    # Shapes consistent with OutConv: batch=2, in_channels=4, out_channels=3,
    # spatial 16x16.
    N, C_in, C_out, H, W = 2, 4, 3, 16, 16

    key = jax.random.PRNGKey(0)
    kx, kw, kb = jax.random.split(key, 3)

    x = jax.random.normal(kx, (N, C_in, H, W), dtype=jnp.float32)
    # Deterministic parameter init (mimics Conv2d's uniform(-1/sqrt(fan_in), +))
    fan_in = C_in  # kernel_size = 1
    bound = 1.0 / jnp.sqrt(fan_in)
    weight = jax.random.uniform(kw, (C_out, C_in, 1, 1), jnp.float32, -bound, bound)
    bias = jax.random.uniform(kb, (C_out,), jnp.float32, -bound, bound)

    y = out_conv(x, weight, bias)
    jax.block_until_ready(y)
    y_ref = _ref_conv1x1(x, weight, bias)
    assert y.shape == (N, C_out, H, W)
    assert jnp.allclose(y, y_ref, atol=1e-5, rtol=1e-5)

    # Second check: exercise the ragged-last-block path (HW % t != 0) and the
    # v7x N==1 tile split, with a small forced tile.
    N2, H2, W2 = 1, 16, 10                     # HW = 160
    x2 = jax.random.normal(jax.random.PRNGKey(1), (N2, C_in, H2, W2), jnp.float32)
    y2 = out_conv(x2, weight, bias, tile_pixels=128)
    jax.block_until_ready(y2)
    y2_ref = _ref_conv1x1(x2, weight, bias)
    assert y2.shape == (N2, C_out, H2, W2)
    assert jnp.allclose(y2, y2_ref, atol=1e-5, rtol=1e-5)

    print("KERNEL_OK")
</pallas_src>

<mosaic_0001>
module attributes {stable_mosaic.version = 11 : i64} {
  func.func @_outconv_kernel(%arg0: i32, %arg1: i32, %arg2: memref<1x4x256xf32, #tpu.memory_space<vmem>>, %arg3: memref<3x4xf32, #tpu.memory_space<vmem>>, %arg4: memref<3x1xf32, #tpu.memory_space<vmem>>, %arg5: memref<1x3x256xf32, #tpu.memory_space<vmem>>) attributes {dimension_semantics = [#tpu.dimension_semantics<parallel>, #tpu.dimension_semantics<parallel>], iteration_bounds = array<i64: 2, 1>, scalar_prefetch = 0 : i64, scratch_operands = 0 : i64, tpu.core_type = #tpu.core_type<tc>, window_params = [{transform_indices = @transform_0, window_bounds = array<i64: 1, 4, 256>}, {pipeline_mode = #tpu.pipeline_mode<synchronous>, transform_indices = @transform_1, window_bounds = array<i64: 3, 4>}, {pipeline_mode = #tpu.pipeline_mode<synchronous>, transform_indices = @transform_2, window_bounds = array<i64: 3, 1>}, {transform_indices = @transform_3, window_bounds = array<i64: 1, 3, 256>}]} {
    %c0 = arith.constant 0 : index
    %c0_0 = arith.constant 0 : index
    %0 = vector.load %arg3[%c0, %c0_0] : memref<3x4xf32, #tpu.memory_space<vmem>>, vector<3x4xf32>
    %c0_1 = arith.constant 0 : index
    %c0_2 = arith.constant 0 : index
    %c0_3 = arith.constant 0 : index
    %1 = vector.load %arg2[%c0_1, %c0_2, %c0_3] : memref<1x4x256xf32, #tpu.memory_space<vmem>>, vector<1x4x256xf32>
    %2 = vector.shape_cast %1 : vector<1x4x256xf32> to vector<4x256xf32>
    %cst = arith.constant dense<0.000000e+00> : vector<3x256xf32>
    %3 = tpu.matmul %0, %2, %cst {dimension_numbers = #tpu.dot_dimension_numbers<[1], [0], [0], [1], [0, 0, 1, 1], [], []>} : vector<3x4xf32>, vector<4x256xf32>, vector<3x256xf32> -> vector<3x256xf32>
    %c0_4 = arith.constant 0 : index
    %c0_5 = arith.constant 0 : index
    %4 = vector.load %arg4[%c0_4, %c0_5] : memref<3x1xf32, #tpu.memory_space<vmem>>, vector<3x1xf32>
    %5 = vector.broadcast %4 : vector<3x1xf32> to vector<3x256xf32>
    %6 = arith.addf %3, %5 : vector<3x256xf32>
    %c0_6 = arith.constant 0 : index
    %c0_7 = arith.constant 0 : index
    %c0_8 = arith.constant 0 : index
    %7 = vector.load %arg5[%c0_6, %c0_7, %c0_8] : memref<1x3x256xf32, #tpu.memory_space<vmem>>, vector<1x3x256xf32>
    %8 = vector.shape_cast %7 : vector<1x3x256xf32> to vector<3x256xf32>
    %9 = vector.shape_cast %6 : vector<3x256xf32> to vector<1x3x256xf32>
    tpu.vector_store %arg5[%c0_6, %c0_7, %c0_8], %9 {strides = array<i32>} : memref<1x3x256xf32, #tpu.memory_space<vmem>>, vector<1x3x256xf32>,
    return
  }
  func.func @transform_0(%arg0: i32, %arg1: i32) -> (i32, i32, i32) {
    %c0_i32 = arith.constant 0 : i32
    %c0_i32_0 = arith.constant 0 : i32
    return %arg0, %c0_i32, %arg1 : i32, i32, i32
  }
  func.func @transform_1(%arg0: i32, %arg1: i32) -> (i32, i32) {
    %c0_i32 = arith.constant 0 : i32
    %c0_i32_0 = arith.constant 0 : i32
    %c0_i32_1 = arith.constant 0 : i32
    return %c0_i32, %c0_i32_0 : i32, i32
  }
  func.func @transform_2(%arg0: i32, %arg1: i32) -> (i32, i32) {
    %c0_i32 = arith.constant 0 : i32
    %c0_i32_0 = arith.constant 0 : i32
    %c0_i32_1 = arith.constant 0 : i32
    return %c0_i32, %c0_i32_0 : i32, i32
  }
  func.func @transform_3(%arg0: i32, %arg1: i32) -> (i32, i32, i32) {
    %c0_i32 = arith.constant 0 : i32
    %c0_i32_0 = arith.constant 0 : i32
    return %arg0, %c0_i32, %arg1 : i32, i32, i32
  }
}

</mosaic_0001>

<bundles_post_ra>
// kernel: out_conv.1
= control target key start
LH: loop header
LB: loop body
LE: loop exit
PB: predicated region body
PF: predicated region fallthrough
CT: control target
= control target key end

     0   :  { %s482_s12 = smov 0   ;;  %s484_s13 = smov 0   ;;  %s521_s0 = inlined_call_operand.vmem [shape: f32[2,4,256], index: 0, kind: input, shape index: {}]   ;;  %s522_s1 = inlined_call_operand.vmem [shape: f32[3,4], index: 1, kind: input, shape index: {}]   ;;  %s523_s2 = inlined_call_operand.vmem [shape: f32[3,1], index: 2, kind: input, shape index: {}]   ;;  %s524_s3 = inlined_call_operand.vmem [shape: f32[2,3,256], index: 3, kind: output, shape index: {}]  }
   0x1   :  { %s486_s14 = smov 0  }
   0x2 LB: > { %s25_s15 = sadd.s32 1, %s454_s13  ;;  %p396_p0 = scmp.ge.s32.totalorder %s458_s14, 1  ;;  %s458_s14 = sphi %s486_s14, %s13_s14   ;;  %s454_s13 = sphi %s484_s13, %s526_s13   ;;  %s450_s12 = sphi %s482_s12, %s525_s12  }
   0x3   : > { %p27_p1 = scmp.ge.s32.totalorder %s25_s15, 2  ;;  %p158_p2 = scmp.lt.s32.totalorder %s458_s14, 3 }
   0x5   : > { %s528_s15 = smov (%p27_p1, %s25_s15), 0  ;;  %p159_p3 = pnand %p396_p0, %p158_p2 }
   0x6   : > { %p191_p4 = scmp.lt.s32.totalorder (!%p159_p3), %s450_s12, 1 }
   0x7   : > { %162 = sbr.rel (%p159_p3) target bundleno = 220 (0xdc), region = 32 }
   0xc   : > { %v460_v0 = vmov 0.0   ;;  %v212_v1 = vld [vmem:[%s523_s2] sm:$0x7]  ;;  %s530_s12 = smov (!%p191_p4, %s450_s12), 1  ;;  %v461_v2 = vmov 0   ;;  %vm224_vm0 = vcmask 1043456  }
   0xd   : > { %293 = vmatprep.mubr.f32.mxu0 %v460_v0  ;;  %434 = vset.pattern.permute.xlu0 %v461_v2  ;;  %s406_s18 = sshll.u32 %s530_s12, 3  ;;  %v210_v5 = vld [vmem:[%s522_s1] sm:$0x7]  ;;  %vm220_vm1 = vcmask 31744  }
   0xe   : > { %215 = vperm.xlu0 %434, %v212_v1   ;;  %s198_s21 = scalar_lea.vmem %s521_s0, %s406_s18  ;;  %s208_s26 = scalar_lea.vmem %s524_s3, %s406_s18 }
   0xf   : > { %v211_v3 = vld [vmem:[%s198_s21] sm:$0xff] }
  0x10   : > { %v219_v4 = vcombine.high %v211_v3, %v211_v3 }
  0x12   : > { %401 = vmatprep.subr.msk.mxu0 %vm224_vm0, %v219_v4 }
  0x13   : > { %402 = vmatpush1.msk.msra.mxu0 %vm224_vm0, %v211_v3 }
  0x14   : > { %403 = vmatmul.mubr.msk.f32.vlgmr.msra.gmra.mxu0 %vm220_vm1, %v210_v5 }
  0x89   : > { %v216_v6 = vpop.permute.xlu0 %215 }
  0xd4   : > { %v295_v7 = vpop.f32.mrf.mxu0 }
  0xd5   : > { %v296_v9 = vadd.f32 %v295_v7, %v216_v6 }
  0xd6   : > { %v297_v8 = vpop.f32.mrf.mxu0 }
  0xd7   : > { %v298_v10 = vadd.f32 %v297_v8, %v216_v6 }
  0xd9   : > { %v302_v11 = vcombine.low %v296_v9, %v298_v10 }
  0xdb   : > { %304 = vst [vmem:[%s208_s26] sm:$0x77] %v302_v11 }
  0xdc PF: > { %s13_s14 = sadd.s32 1, %s458_s14   ;;  %s525_s12 = smov %s454_s13 }
  0xdd   : > { %p10_p5 = scmp.ge.s32.totalorder %s13_s14, 4   ;;  %s526_s13 = smov %s528_s15 }
  0xdf   :  { %12 = sbr.rel (!%p10_p5) target bundleno = 2 (0x2), region = 62 }

</bundles_post_ra>
